<compile_context>
chip_gen: v5e
topology: v5e:2x2
jax: 0.10.0
libtpu: 0.0.40
codegen_flags: <defaults>
</compile_context>

<pallas_src>
import math

import jax
import jax.numpy as jnp
from jax.experimental import pallas as pl
from jax.experimental.pallas import tpu as pltpu


def _round_up(n, m):
    return ((n + m - 1) // m) * m


def _gmm_kernel(xt_ref, w_ref, b_ref, o_ref):
    # xt_ref: (D, TN)   samples on lanes
    # w_ref : (K, 2D)   fused weights: [-0.5/cov | mu/cov]
    # b_ref : (K, 1)    log(lamda_k) + log_norl_k - 0.5*sum_d mu^2/cov
    # o_ref : (1, TN)   mixture likelihood per sample
    xt = xt_ref[...]
    x_aug = jnp.concatenate([xt * xt, xt], axis=0)                    # (2D, TN)
    e = jnp.dot(w_ref[...], x_aug,
                preferred_element_type=jnp.float32) + b_ref[...]      # (K, TN)
    o_ref[...] = jnp.sum(jnp.exp(e), axis=0, keepdims=True)           # (1, TN)


def gmm_likelihood(x, mu, cov, weight, *, tn=2048):
    """GMM likelihood matching Generator.forward. Returns (N, 1) float32."""
    N, D = x.shape
    K = mu.shape[0]

    x = x.astype(jnp.float32)
    mu = mu.astype(jnp.float32)
    cov = cov.astype(jnp.float32)
    weight = weight.astype(jnp.float32)

    # ---- parameter-only math, hoisted out of the kernel -------------------
    sw = jax.nn.sigmoid(weight)
    lam = sw / jnp.sum(sw)                                            # (K,)
    inv_cov = 1.0 / cov                                               # (K, D)
    # exponent[k, n] = -0.5*(invcov_k . x_n^2) + (mu_k*invcov_k) . x_n + bias_k
    w_fused = jnp.concatenate([-0.5 * inv_cov, mu * inv_cov], axis=1)  # (K, 2D)
    c = jnp.sum(mu * mu * inv_cov, axis=1)                            # (K,)
    log_norl = -0.5 * (jnp.sum(jnp.log(cov), axis=1)
                       + D * math.log(2.0 * math.pi))                 # (K,)
    bias = (jnp.log(lam) + log_norl - 0.5 * c).reshape(K, 1)          # (K, 1)

    # ---- lane-dense layout: samples on the lane axis ----------------------
    xt = x.T                                                          # (D, N)
    tn_eff = _round_up(min(int(tn), _round_up(N, 128)), 128)
    n_pad = _round_up(N, tn_eff)
    if n_pad != N:
        xt = jnp.pad(xt, ((0, 0), (0, n_pad - N)))                    # zero pad

    out = pl.pallas_call(
        _gmm_kernel,
        out_shape=jax.ShapeDtypeStruct((1, n_pad), jnp.float32),
        grid=(n_pad // tn_eff,),
        in_specs=[
            pl.BlockSpec((D, tn_eff), lambda i: (0, i)),   # x tile (lane-dense)
            pl.BlockSpec((K, 2 * D), lambda i: (0, 0)),    # fused weights (resident)
            pl.BlockSpec((K, 1), lambda i: (0, 0)),        # fused bias (resident)
        ],
        out_specs=pl.BlockSpec((1, tn_eff), lambda i: (0, i)),
        compiler_params=pltpu.CompilerParams(
            dimension_semantics=("parallel",)),
    )(xt, w_fused, bias)

    return out[0, :N].reshape(N, 1)


def _reference(x, mu, cov, weight):
    """Pure-JAX replica of the PyTorch forward (for validation)."""
    K, D = mu.shape
    sw = jax.nn.sigmoid(weight)
    lam = sw / jnp.sum(sw)
    probs = []
    for i in range(K):
        diff = x - mu[i]
        up = jnp.square(diff) @ (1.0 / cov[i])
        det = jnp.prod(cov[i])
        norl = 1.0 / jnp.sqrt(det * (2.0 * math.pi) ** D)
        probs.append(norl * jnp.exp(-0.5 * up))
    probs = jnp.stack(probs, axis=1)
    return (probs @ lam).reshape(x.shape[0], -1)


if __name__ == "__main__":
    # Small shapes consistent with the module: x is (num_samples, num_variables).
    N, D, K = 16, 8, 4

    key = jax.random.PRNGKey(0)
    kx, kmu = jax.random.split(key)
    x = jax.random.normal(kx, (N, D), dtype=jnp.float32)

    # Deterministic parameter init matching Generator.__init__:
    mu = jax.random.normal(kmu, (K, D), dtype=jnp.float32)   # torch.randn
    cov = jnp.ones((K, D), dtype=jnp.float32)                # torch.ones
    weight = jnp.ones((K,), dtype=jnp.float32)               # torch.ones

    out = gmm_likelihood(x, mu, cov, weight)
    out = jax.block_until_ready(out)

    ref = _reference(x, mu, cov, weight)
    assert out.shape == (N, 1)
    assert jnp.allclose(out, ref, rtol=1e-3, atol=1e-9), (out, ref)

    print("KERNEL_OK")
</pallas_src>

<mosaic_0001>
module attributes {stable_mosaic.version = 11 : i64} {
  func.func @_gmm_kernel(%arg0: i32, %arg1: memref<8x128xf32, #tpu.memory_space<vmem>>, %arg2: memref<4x16xf32, #tpu.memory_space<vmem>>, %arg3: memref<4x1xf32, #tpu.memory_space<vmem>>, %arg4: memref<1x128xf32, #tpu.memory_space<vmem>>) attributes {dimension_semantics = [#tpu.dimension_semantics<parallel>], iteration_bounds = array<i64: 1>, scalar_prefetch = 0 : i64, scratch_operands = 0 : i64, tpu.core_type = #tpu.core_type<tc>, window_params = [{transform_indices = @transform_0, window_bounds = array<i64: 8, 128>}, {pipeline_mode = #tpu.pipeline_mode<synchronous>, transform_indices = @transform_1, window_bounds = array<i64: 4, 16>}, {pipeline_mode = #tpu.pipeline_mode<synchronous>, transform_indices = @transform_2, window_bounds = array<i64: 4, 1>}, {transform_indices = @transform_3, window_bounds = array<i64: 1, 128>}]} {
    %c0 = arith.constant 0 : index
    %c0_0 = arith.constant 0 : index
    %0 = vector.load %arg1[%c0, %c0_0] : memref<8x128xf32, #tpu.memory_space<vmem>>, vector<8x128xf32>
    %1 = arith.mulf %0, %0 : vector<8x128xf32>
    %2 = tpu.concatenate %1, %0 in 0 : vector<8x128xf32>, vector<8x128xf32> -> vector<16x128xf32>
    %c0_1 = arith.constant 0 : index
    %c0_2 = arith.constant 0 : index
    %3 = vector.load %arg2[%c0_1, %c0_2] : memref<4x16xf32, #tpu.memory_space<vmem>>, vector<4x16xf32>
    %cst = arith.constant dense<0.000000e+00> : vector<4x128xf32>
    %4 = tpu.matmul %3, %2, %cst {dimension_numbers = #tpu.dot_dimension_numbers<[1], [0], [0], [1], [0, 0, 1, 1], [], []>} : vector<4x16xf32>, vector<16x128xf32>, vector<4x128xf32> -> vector<4x128xf32>
    %c0_3 = arith.constant 0 : index
    %c0_4 = arith.constant 0 : index
    %5 = vector.load %arg3[%c0_3, %c0_4] : memref<4x1xf32, #tpu.memory_space<vmem>>, vector<4x1xf32>
    %6 = vector.broadcast %5 : vector<4x1xf32> to vector<4x128xf32>
    %7 = arith.addf %4, %6 : vector<4x128xf32>
    %8 = math.exp %7 : vector<4x128xf32>
    %cst_5 = arith.constant dense<0.000000e+00> : vector<128xf32>
    %9 = vector.multi_reduction <add>, %8, %cst_5 [0] : vector<4x128xf32> to vector<128xf32>
    %10 = vector.shape_cast %9 : vector<128xf32> to vector<1x128xf32>
    %c0_6 = arith.constant 0 : index
    %c0_7 = arith.constant 0 : index
    %11 = vector.load %arg4[%c0_6, %c0_7] : memref<1x128xf32, #tpu.memory_space<vmem>>, vector<1x128xf32>
    tpu.vector_store %arg4[%c0_6, %c0_7], %10 {strides = array<i32>} : memref<1x128xf32, #tpu.memory_space<vmem>>, vector<1x128xf32>,
    return
  }
  func.func @transform_0(%arg0: i32) -> (i32, i32) {
    %c0_i32 = arith.constant 0 : i32
    %c0_i32_0 = arith.constant 0 : i32
    return %c0_i32, %arg0 : i32, i32
  }
  func.func @transform_1(%arg0: i32) -> (i32, i32) {
    %c0_i32 = arith.constant 0 : i32
    %c0_i32_0 = arith.constant 0 : i32
    %c0_i32_1 = arith.constant 0 : i32
    return %c0_i32, %c0_i32_0 : i32, i32
  }
  func.func @transform_2(%arg0: i32) -> (i32, i32) {
    %c0_i32 = arith.constant 0 : i32
    %c0_i32_0 = arith.constant 0 : i32
    %c0_i32_1 = arith.constant 0 : i32
    return %c0_i32, %c0_i32_0 : i32, i32
  }
  func.func @transform_3(%arg0: i32) -> (i32, i32) {
    %c0_i32 = arith.constant 0 : i32
    %c0_i32_0 = arith.constant 0 : i32
    return %c0_i32, %arg0 : i32, i32
  }
}

</mosaic_0001>

<bundles_post_ra>
// kernel: tpu_custom_call.1
= control target key start
LH: loop header
LB: loop body
LE: loop exit
PB: predicated region body
PF: predicated region fallthrough
CT: control target
= control target key end

     0   :  { %8 = vsyncpa [#allocation3], 0  ;;  %s184_s0 = inlined_call_operand.hbm [shape: f32[8,128], index: 0, kind: input, shape index: {}]   ;;  %s185_s1 = inlined_call_operand.vmem [shape: f32[4,16], index: 1, kind: input, shape index: {}]   ;;  %s186_s2 = inlined_call_operand.vmem [shape: f32[4,1], index: 2, kind: input, shape index: {}]   ;;  %s187_s3 = inlined_call_operand.hbm [shape: f32[1,128], index: 3, kind: output, shape index: {}]  }
   0x1   :  { %9 = vsyncpa [#allocation4], 0  ;;  %s15_s14 = sshll.u32 %s184_s0, 4  ;;  %s149_s15 = smov [#allocation2]   ;;  %s16_s14 = int_to_ptr.hbm [resolvable:$true] %s15_s14 }
   0x2   :  { %s17_s16 = sshll.u32 %s149_s15, 4  ;;  %s18_s16 = int_to_ptr.vmem [resolvable:$true] %s17_s16 }
   0x3   :  { %20 = dma.hbm_to_vmem [thread:$0]  %s16_s14, 128, %s18_s16, [#allocation3]  }
   0x4   :  { %145 = dma.done.wait [#allocation3], 128  }
   0x5   :  { %146 = vsyncadd [#allocation3], 4294967168  ;;  %v150_v0 = vmov 0   ;;  %v29_v1 = vld [vmem:[#allocation2] sm:$0xff]  ;;  %vm38_vm0 = vcmask 130048   ;;  %vm64_vm1 = vcmask 1043456  }
   0x6   :  { %94 = vset.pattern.permute.xlu0 %v150_v0  ;;  %v32_v2 = vld [vmem:[%s186_s2] sm:$0xf]  ;;  %56 = vmatpush.msra.mxu0 %v29_v1  ;;  %v30_v3 = vmul.f32 %v29_v1, %v29_v1  ;;  %s151_s0 = smov [#allocation5]   ;;  %s80_s22 = sshll.u32 %s187_s3, 4  ;;  %s81_s22 = int_to_ptr.hbm [resolvable:$true] %s80_s22 }
   0x7   :  { %v31_v4 = vld [vmem:[%s185_s1] sm:$0xf]  ;;  %35 = vperm.xlu0 %94, %v32_v2   ;;  %s78_s2 = sshll.u32 %s151_s0, 4  ;;  %s79_s2 = int_to_ptr.vmem [resolvable:$true] %s78_s2 }
   0x8   :  { %57 = vmatpush.msra.mxu0 %v30_v3 }
   0x9   :  { %90 = vmatmul.msk.f32.vlgmr.msra.gmra.mxu0 %vm38_vm0, %v31_v4 }
  0x79   :  { %v36_v5 = vpop.permute.xlu0 %35 }
  0x86   :  { %v59_v6 = vpop.f32.mrf.mxu0 }
  0x87   :  { %v60_v7 = vadd.f32 %v59_v6, %v36_v5 }
  0x89   :  { %v62_v8 = vmul.f32 1.442695, %v60_v7 }
  0x8b   :  { %95 = vpow2.f32 %v62_v8 }
  0x91   :  { %v96_v9 = vpop.eup %95 }
  0x92   :  { %v65_v10 = vsel %vm64_vm1, %v96_v9, 0.0 }
  0x93   :  { %v66_v11 = vrot.slane %v65_v10, 4 }
  0x95   :  { %v67_v12 = vadd.f32 %v66_v11, %v65_v10 }
  0x97   :  { %v68_v13 = vrot.slane %v67_v12, 2 }
  0x99   :  { %v69_v14 = vadd.f32 %v68_v13, %v67_v12 }
  0x9b   :  { %v70_v15 = vrot.slane %v69_v14, 1 }
  0x9d   :  { %v71_v16 = vadd.f32 %v70_v15, %v69_v14 }
  0x9f   :  { %72 = vst [vmem:[#allocation5] sm:$0x1] %v71_v16 }
  0xa0   :  { %83 = dma.vmem_to_hbm [thread:$0]  %s79_s2, 16, %s81_s22, [#allocation4]  }
  0xa1   :  { %147 = dma.done.wait [#allocation4], 16  }
  0xa2   :  { %148 = vsyncadd [#allocation4], 4294967280 }
  0xa3   :  { %88 = vsyncpa [#allocation3], 1 }
  0xa4   :  { %89 = vsyncpa [#allocation4], 1 }

</bundles_post_ra>
